<compile_context>
chip_gen: v7x
topology: tpu7x:2x2x1
jax: 0.10.0
libtpu: 0.0.40
codegen_flags: <defaults>
</compile_context>

<pallas_src>
import functools

import jax
import jax.numpy as jnp
from jax import lax
from jax.experimental import pallas as pl
from jax.experimental.pallas import tpu as pltpu


def _pick_block_b(batch: int, seq: int, target_rows: int = 256) -> int:
    """Largest divisor of `batch` such that block_b*seq ~<= target_rows while
    keeping >= 2 grid steps when batch >= 2 (v7x: 2 TensorCores)."""
    cap = max(1, target_rows // max(seq, 1))
    if batch >= 2:
        cap = min(cap, batch // 2)
    cap = max(1, min(cap, batch))
    for bb in range(cap, 0, -1):
        if batch % bb == 0:
            return bb
    return 1


def _attention_kernel(x_ref, g_ref, b_ref, wqkv_ref, wo_ref, o_ref, ctx_ref, *,
                      block_b: int, seq: int, heads: int, head_channels: int,
                      eps: float):
    Bb, N, H, D = block_b, seq, heads, head_channels
    inner = H * D

    x = x_ref[...]                                   # (Bb*N, C) f32

    # --- LayerNorm over channels (biased variance, matches nn.LayerNorm).
    mu = jnp.mean(x, axis=-1, keepdims=True)
    var = jnp.mean((x - mu) * (x - mu), axis=-1, keepdims=True)
    xn = (x - mu) * lax.rsqrt(var + eps) * g_ref[...] + b_ref[...]

    # --- Fused QKV projection: one (Bb*N, C) @ (C, 3*H*D) bf16 matmul, f32 acc.
    #     The softmax scale is already folded into the q columns of wqkv.
    qkv = jnp.dot(xn.astype(jnp.bfloat16), wqkv_ref[...],
                  preferred_element_type=jnp.float32)   # (Bb*N, 3*inner) f32

    # --- Per-(batch, head) scaled-dot-product attention. Each head's context
    #     is stored straight into the VMEM scratch slab, so only one head's
    #     tiles stay live (no concat, bounded vreg pressure).
    # TODO(synk): at production H*D, pad D to 128 lanes (or stage qkv through a
    # (3*H, rows, D) scratch) so these per-head column slices are lane-aligned.
    for b in range(Bb):
        r = b * N
        for h in range(H):
            q = qkv[r:r + N, h * D:(h + 1) * D]
            k = qkv[r:r + N, inner + h * D:inner + (h + 1) * D]
            v = qkv[r:r + N, 2 * inner + h * D:2 * inner + (h + 1) * D]

            # q @ k^T without a materialized transpose (contract last dims).
            s = lax.dot_general(q.astype(jnp.bfloat16), k.astype(jnp.bfloat16),
                                (((1,), (1,)), ((), ())),
                                preferred_element_type=jnp.float32)   # (N, N)
            s = s - jnp.max(s, axis=-1, keepdims=True)                # stable
            p = jnp.exp(s)
            p = p * pl.reciprocal(jnp.sum(p, axis=-1, keepdims=True), approx=True)
            ctx_ref[r:r + N, h * D:(h + 1) * D] = jnp.dot(
                p.astype(jnp.bfloat16), v.astype(jnp.bfloat16),
                preferred_element_type=jnp.float32)

    # --- Fused output projection: one (Bb*N, H*D) @ (H*D, C) bf16 matmul.
    o_ref[...] = jnp.dot(ctx_ref[...].astype(jnp.bfloat16), wo_ref[...],
                         preferred_element_type=jnp.float32)


def attention_pallas(x, gamma, beta, w_qkv, w_out, *, heads: int,
                     head_channels: int, eps: float = 1e-5, block_b=None):
    """x: (B, N, C) f32; gamma/beta: (C,); w_qkv: (C, 3*H*D); w_out: (H*D, C)."""
    B, N, C = x.shape
    H, D = heads, head_channels
    inner = H * D
    scale = float(D) ** -0.5

    if block_b is None:
        block_b = _pick_block_b(B, N)
    assert B % block_b == 0
    grid_b = B // block_b
    rows = block_b * N

    # One-time weight prep: fold softmax scale into the q columns, cast slabs
    # to bf16 (MXU-native; halves weight VMEM).
    wqkv_b16 = jnp.concatenate(
        [w_qkv[:, :inner] * scale, w_qkv[:, inner:]], axis=-1
    ).astype(jnp.bfloat16)
    wo_b16 = w_out.astype(jnp.bfloat16)

    kernel = functools.partial(_attention_kernel, block_b=block_b, seq=N,
                               heads=H, head_channels=D, eps=eps)

    out = pl.pallas_call(
        kernel,
        out_shape=jax.ShapeDtypeStruct((B * N, C), jnp.float32),
        grid_spec=pltpu.PrefetchScalarGridSpec(
            num_scalar_prefetch=0,
            grid=(grid_b,),
            in_specs=[
                pl.BlockSpec((rows, C), lambda i: (i, 0)),       # x row slab
                pl.BlockSpec((1, C), lambda i: (0, 0)),          # gamma
                pl.BlockSpec((1, C), lambda i: (0, 0)),          # beta
                pl.BlockSpec((C, 3 * inner), lambda i: (0, 0)),  # fused w_qkv (bf16)
                pl.BlockSpec((inner, C), lambda i: (0, 0)),      # w_out (bf16)
            ],
            out_specs=pl.BlockSpec((rows, C), lambda i: (i, 0)),
            scratch_shapes=[pltpu.VMEM((rows, inner), jnp.float32)],
        ),
        compiler_params=pltpu.CompilerParams(
            dimension_semantics=("parallel",),
            vmem_limit_bytes=32 * 1024 * 1024,
        ),
    )(x.reshape(B * N, C), gamma.reshape(1, C), beta.reshape(1, C),
      wqkv_b16, wo_b16)

    return out.reshape(B, N, C)


def attention_reference(x, gamma, beta, w_qkv, w_out, *, heads, head_channels,
                        eps=1e-5):
    B, N, C = x.shape
    H, D = heads, head_channels
    mu = jnp.mean(x, axis=-1, keepdims=True)
    var = jnp.mean((x - mu) ** 2, axis=-1, keepdims=True)
    xn = (x - mu) / jnp.sqrt(var + eps) * gamma + beta
    qkv = xn @ w_qkv                                           # (B, N, 3*H*D)
    q, k, v = jnp.split(qkv, 3, axis=-1)

    def heads_first(t):
        return t.reshape(B, N, H, D).transpose(0, 2, 1, 3)     # (B, H, N, D)

    q, k, v = map(heads_first, (q, k, v))
    dots = jnp.einsum("bhnd,bhmd->bhnm", q, k) * (D ** -0.5)
    attn = jax.nn.softmax(dots, axis=-1)
    out = jnp.einsum("bhnm,bhmd->bhnd", attn, v)
    out = out.transpose(0, 2, 1, 3).reshape(B, N, H * D)
    return out @ w_out


if __name__ == "__main__":
    # Small shapes consistent with the module.
    B, N = 2, 8            # batch, sequence length
    HID = 32               # hid_channels
    HEADS, HEAD_C = 2, 16  # heads, head_channels
    INNER = HEADS * HEAD_C

    key = jax.random.PRNGKey(0)
    kx, kq, ko = jax.random.split(key, 3)
    x = jax.random.normal(kx, (B, N, HID), dtype=jnp.float32)
    # nn.LayerNorm defaults: weight=1, bias=0
    gamma = jnp.ones((HID,), dtype=jnp.float32)
    beta = jnp.zeros((HID,), dtype=jnp.float32)
    # Linear weights stored as (in, out); PyTorch keeps (out, in) and applies
    # x @ W.T — mathematically equivalent parameterization.
    w_qkv = jax.random.normal(kq, (HID, 3 * INNER), dtype=jnp.float32) * 0.05
    w_out = jax.random.normal(ko, (INNER, HID), dtype=jnp.float32) * 0.05

    out = attention_pallas(x, gamma, beta, w_qkv, w_out,
                           heads=HEADS, head_channels=HEAD_C)
    out = jax.block_until_ready(out)

    ref = attention_reference(x, gamma, beta, w_qkv, w_out,
                              heads=HEADS, head_channels=HEAD_C)
    assert out.shape == (B, N, HID)
    # Tolerance accounts for bf16 MXU operands + EUP approximate reciprocal
    # (the f32 reference path above is the exact PyTorch-equivalent math).
    assert jnp.allclose(out, ref, atol=1e-2, rtol=1e-2), "mismatch vs reference"
    print("KERNEL_OK")
</pallas_src>

<mosaic_0001>
module attributes {stable_mosaic.version = 11 : i64} {
  func.func @_attention_kernel(%arg0: i32, %arg1: memref<8x32xf32, #tpu.memory_space<vmem>>, %arg2: memref<1x32xf32, #tpu.memory_space<vmem>>, %arg3: memref<1x32xf32, #tpu.memory_space<vmem>>, %arg4: memref<32x96xbf16, #tpu.memory_space<vmem>>, %arg5: memref<32x32xbf16, #tpu.memory_space<vmem>>, %arg6: memref<8x32xf32, #tpu.memory_space<vmem>>, %arg7: memref<8x32xf32, #tpu.memory_space<vmem>>) attributes {dimension_semantics = [#tpu.dimension_semantics<parallel>], iteration_bounds = array<i64: 2>, scalar_prefetch = 0 : i64, scratch_operands = 1 : i64, tpu.core_type = #tpu.core_type<tc>, window_params = [{transform_indices = @transform_0, window_bounds = array<i64: 8, 32>}, {pipeline_mode = #tpu.pipeline_mode<synchronous>, transform_indices = @transform_1, window_bounds = array<i64: 1, 32>}, {pipeline_mode = #tpu.pipeline_mode<synchronous>, transform_indices = @transform_2, window_bounds = array<i64: 1, 32>}, {pipeline_mode = #tpu.pipeline_mode<synchronous>, transform_indices = @transform_3, window_bounds = array<i64: 32, 96>}, {pipeline_mode = #tpu.pipeline_mode<synchronous>, transform_indices = @transform_4, window_bounds = array<i64: 32, 32>}, {transform_indices = @transform_5, window_bounds = array<i64: 8, 32>}]} {
    %c0 = arith.constant 0 : index
    %c0_0 = arith.constant 0 : index
    %0 = vector.load %arg1[%c0, %c0_0] : memref<8x32xf32, #tpu.memory_space<vmem>>, vector<8x32xf32>
    %cst = arith.constant dense<0.000000e+00> : vector<8xf32>
    %1 = vector.multi_reduction <add>, %0, %cst [1] : vector<8x32xf32> to vector<8xf32>
    %2 = vector.shape_cast %1 : vector<8xf32> to vector<8x1xf32>
    %cst_1 = arith.constant 3.200000e+01 : f32
    %3 = vector.broadcast %cst_1 : f32 to vector<8x1xf32>
    %4 = arith.divf %2, %3 : vector<8x1xf32>
    %5 = vector.broadcast %4 : vector<8x1xf32> to vector<8x32xf32>
    %6 = arith.subf %0, %5 : vector<8x32xf32>
    %7 = vector.broadcast %4 : vector<8x1xf32> to vector<8x32xf32>
    %8 = arith.subf %0, %7 : vector<8x32xf32>
    %9 = arith.mulf %6, %8 : vector<8x32xf32>
    %cst_2 = arith.constant dense<0.000000e+00> : vector<8xf32>
    %10 = vector.multi_reduction <add>, %9, %cst_2 [1] : vector<8x32xf32> to vector<8xf32>
    %11 = vector.shape_cast %10 : vector<8xf32> to vector<8x1xf32>
    %cst_3 = arith.constant 3.200000e+01 : f32
    %12 = vector.broadcast %cst_3 : f32 to vector<8x1xf32>
    %13 = arith.divf %11, %12 : vector<8x1xf32>
    %14 = vector.broadcast %4 : vector<8x1xf32> to vector<8x32xf32>
    %15 = arith.subf %0, %14 : vector<8x32xf32>
    %cst_4 = arith.constant 9.99999974E-6 : f32
    %16 = vector.broadcast %cst_4 : f32 to vector<8x1xf32>
    %17 = arith.addf %13, %16 : vector<8x1xf32>
    %18 = math.rsqrt %17 : vector<8x1xf32>
    %19 = vector.broadcast %18 : vector<8x1xf32> to vector<8x32xf32>
    %20 = arith.mulf %15, %19 : vector<8x32xf32>
    %c0_5 = arith.constant 0 : index
    %c0_6 = arith.constant 0 : index
    %21 = vector.load %arg2[%c0_5, %c0_6] : memref<1x32xf32, #tpu.memory_space<vmem>>, vector<1x32xf32>
    %22 = vector.broadcast %21 : vector<1x32xf32> to vector<8x32xf32>
    %23 = arith.mulf %20, %22 : vector<8x32xf32>
    %c0_7 = arith.constant 0 : index
    %c0_8 = arith.constant 0 : index
    %24 = vector.load %arg3[%c0_7, %c0_8] : memref<1x32xf32, #tpu.memory_space<vmem>>, vector<1x32xf32>
    %25 = vector.broadcast %24 : vector<1x32xf32> to vector<8x32xf32>
    %26 = arith.addf %23, %25 : vector<8x32xf32>
    %27 = arith.truncf %26 : vector<8x32xf32> to vector<8x32xbf16>
    %c0_9 = arith.constant 0 : index
    %c0_10 = arith.constant 0 : index
    %28 = vector.load %arg4[%c0_9, %c0_10] : memref<32x96xbf16, #tpu.memory_space<vmem>>, vector<32x96xbf16>
    %cst_11 = arith.constant dense<0.000000e+00> : vector<8x96xf32>
    %29 = tpu.matmul %27, %28, %cst_11 {dimension_numbers = #tpu.dot_dimension_numbers<[1], [0], [0], [1], [0, 0, 1, 1], [], []>} : vector<8x32xbf16>, vector<32x96xbf16>, vector<8x96xf32> -> vector<8x96xf32>
    %30 = vector.extract_strided_slice %29 {offsets = [0, 0], sizes = [8, 16], strides = [1, 1]} : vector<8x96xf32> to vector<8x16xf32>
    %31 = vector.extract_strided_slice %29 {offsets = [0, 32], sizes = [8, 16], strides = [1, 1]} : vector<8x96xf32> to vector<8x16xf32>
    %32 = vector.extract_strided_slice %29 {offsets = [0, 64], sizes = [8, 16], strides = [1, 1]} : vector<8x96xf32> to vector<8x16xf32>
    %33 = arith.truncf %30 : vector<8x16xf32> to vector<8x16xbf16>
    %34 = arith.truncf %31 : vector<8x16xf32> to vector<8x16xbf16>
    %cst_12 = arith.constant dense<0.000000e+00> : vector<8x8xf32>
    %35 = tpu.matmul %33, %34, %cst_12 {dimension_numbers = #tpu.dot_dimension_numbers<[1], [1], [0], [0], [0, 0, 1, 0], [], []>} : vector<8x16xbf16>, vector<8x16xbf16>, vector<8x8xf32> -> vector<8x8xf32>
    %cst_13 = arith.constant dense<0xFF800000> : vector<8xf32>
    %36 = vector.multi_reduction <maximumf>, %35, %cst_13 [1] : vector<8x8xf32> to vector<8xf32>
    %37 = vector.shape_cast %36 : vector<8xf32> to vector<8x1xf32>
    %38 = vector.broadcast %37 : vector<8x1xf32> to vector<8x8xf32>
    %39 = arith.subf %35, %38 : vector<8x8xf32>
    %40 = math.exp %39 : vector<8x8xf32>
    %cst_14 = arith.constant dense<0.000000e+00> : vector<8xf32>
    %41 = vector.multi_reduction <add>, %40, %cst_14 [1] : vector<8x8xf32> to vector<8xf32>
    %42 = vector.shape_cast %41 : vector<8xf32> to vector<8x1xf32>
    %43 = tpu.reciprocal %42 {approx = true} : vector<8x1xf32> -> vector<8x1xf32>
    %44 = vector.broadcast %43 : vector<8x1xf32> to vector<8x8xf32>
    %45 = arith.mulf %40, %44 : vector<8x8xf32>
    %46 = arith.truncf %45 : vector<8x8xf32> to vector<8x8xbf16>
    %47 = arith.truncf %32 : vector<8x16xf32> to vector<8x16xbf16>
    %cst_15 = arith.constant dense<0.000000e+00> : vector<8x16xf32>
    %48 = tpu.matmul %46, %47, %cst_15 {dimension_numbers = #tpu.dot_dimension_numbers<[1], [0], [0], [1], [0, 0, 1, 1], [], []>} : vector<8x8xbf16>, vector<8x16xbf16>, vector<8x16xf32> -> vector<8x16xf32>
    %c0_16 = arith.constant 0 : index
    %c0_17 = arith.constant 0 : index
    %49 = vector.load %arg7[%c0_16, %c0_17] : memref<8x32xf32, #tpu.memory_space<vmem>>, vector<8x16xf32>
    tpu.vector_store %arg7[%c0_16, %c0_17], %48 {strides = array<i32>} : memref<8x32xf32, #tpu.memory_space<vmem>>, vector<8x16xf32>,
    %50 = vector.extract_strided_slice %29 {offsets = [0, 16], sizes = [8, 16], strides = [1, 1]} : vector<8x96xf32> to vector<8x16xf32>
    %51 = vector.extract_strided_slice %29 {offsets = [0, 48], sizes = [8, 16], strides = [1, 1]} : vector<8x96xf32> to vector<8x16xf32>
    %52 = vector.extract_strided_slice %29 {offsets = [0, 80], sizes = [8, 16], strides = [1, 1]} : vector<8x96xf32> to vector<8x16xf32>
    %53 = arith.truncf %50 : vector<8x16xf32> to vector<8x16xbf16>
    %54 = arith.truncf %51 : vector<8x16xf32> to vector<8x16xbf16>
    %cst_18 = arith.constant dense<0.000000e+00> : vector<8x8xf32>
    %55 = tpu.matmul %53, %54, %cst_18 {dimension_numbers = #tpu.dot_dimension_numbers<[1], [1], [0], [0], [0, 0, 1, 0], [], []>} : vector<8x16xbf16>, vector<8x16xbf16>, vector<8x8xf32> -> vector<8x8xf32>
    %cst_19 = arith.constant dense<0xFF800000> : vector<8xf32>
    %56 = vector.multi_reduction <maximumf>, %55, %cst_19 [1] : vector<8x8xf32> to vector<8xf32>
    %57 = vector.shape_cast %56 : vector<8xf32> to vector<8x1xf32>
    %58 = vector.broadcast %57 : vector<8x1xf32> to vector<8x8xf32>
    %59 = arith.subf %55, %58 : vector<8x8xf32>
    %60 = math.exp %59 : vector<8x8xf32>
    %cst_20 = arith.constant dense<0.000000e+00> : vector<8xf32>
    %61 = vector.multi_reduction <add>, %60, %cst_20 [1] : vector<8x8xf32> to vector<8xf32>
    %62 = vector.shape_cast %61 : vector<8xf32> to vector<8x1xf32>
    %63 = tpu.reciprocal %62 {approx = true} : vector<8x1xf32> -> vector<8x1xf32>
    %64 = vector.broadcast %63 : vector<8x1xf32> to vector<8x8xf32>
    %65 = arith.mulf %60, %64 : vector<8x8xf32>
    %66 = arith.truncf %65 : vector<8x8xf32> to vector<8x8xbf16>
    %67 = arith.truncf %52 : vector<8x16xf32> to vector<8x16xbf16>
    %cst_21 = arith.constant dense<0.000000e+00> : vector<8x16xf32>
    %68 = tpu.matmul %66, %67, %cst_21 {dimension_numbers = #tpu.dot_dimension_numbers<[1], [0], [0], [1], [0, 0, 1, 1], [], []>} : vector<8x8xbf16>, vector<8x16xbf16>, vector<8x16xf32> -> vector<8x16xf32>
    %c0_22 = arith.constant 0 : index
    %c16 = arith.constant 16 : index
    %69 = vector.load %arg7[%c0_22, %c16] : memref<8x32xf32, #tpu.memory_space<vmem>>, vector<8x16xf32>
    tpu.vector_store %arg7[%c0_22, %c16], %68 {strides = array<i32>} : memref<8x32xf32, #tpu.memory_space<vmem>>, vector<8x16xf32>,
    %c0_23 = arith.constant 0 : index
    %c0_24 = arith.constant 0 : index
    %70 = vector.load %arg7[%c0_23, %c0_24] : memref<8x32xf32, #tpu.memory_space<vmem>>, vector<8x32xf32>
    %71 = arith.truncf %70 : vector<8x32xf32> to vector<8x32xbf16>
    %c0_25 = arith.constant 0 : index
    %c0_26 = arith.constant 0 : index
    %72 = vector.load %arg5[%c0_25, %c0_26] : memref<32x32xbf16, #tpu.memory_space<vmem>>, vector<32x32xbf16>
    %cst_27 = arith.constant dense<0.000000e+00> : vector<8x32xf32>
    %73 = tpu.matmul %71, %72, %cst_27 {dimension_numbers = #tpu.dot_dimension_numbers<[1], [0], [0], [1], [0, 0, 1, 1], [], []>} : vector<8x32xbf16>, vector<32x32xbf16>, vector<8x32xf32> -> vector<8x32xf32>
    %c0_28 = arith.constant 0 : index
    %c0_29 = arith.constant 0 : index
    %74 = vector.load %arg6[%c0_28, %c0_29] : memref<8x32xf32, #tpu.memory_space<vmem>>, vector<8x32xf32>
    tpu.vector_store %arg6[%c0_28, %c0_29], %73 {strides = array<i32>} : memref<8x32xf32, #tpu.memory_space<vmem>>, vector<8x32xf32>,
    return
  }
  func.func @transform_0(%arg0: i32) -> (i32, i32) {
    %c0_i32 = arith.constant 0 : i32
    %c0_i32_0 = arith.constant 0 : i32
    return %arg0, %c0_i32 : i32, i32
  }
  func.func @transform_1(%arg0: i32) -> (i32, i32) {
    %c0_i32 = arith.constant 0 : i32
    %c0_i32_0 = arith.constant 0 : i32
    %c0_i32_1 = arith.constant 0 : i32
    return %c0_i32, %c0_i32_0 : i32, i32
  }
  func.func @transform_2(%arg0: i32) -> (i32, i32) {
    %c0_i32 = arith.constant 0 : i32
    %c0_i32_0 = arith.constant 0 : i32
    %c0_i32_1 = arith.constant 0 : i32
    return %c0_i32, %c0_i32_0 : i32, i32
  }
  func.func @transform_3(%arg0: i32) -> (i32, i32) {
    %c0_i32 = arith.constant 0 : i32
    %c0_i32_0 = arith.constant 0 : i32
    %c0_i32_1 = arith.constant 0 : i32
    return %c0_i32, %c0_i32_0 : i32, i32
  }
  func.func @transform_4(%arg0: i32) -> (i32, i32) {
    %c0_i32 = arith.constant 0 : i32
    %c0_i32_0 = arith.constant 0 : i32
    %c0_i32_1 = arith.constant 0 : i32
    return %c0_i32, %c0_i32_0 : i32, i32
  }
  func.func @transform_5(%arg0: i32) -> (i32, i32) {
    %c0_i32 = arith.constant 0 : i32
    %c0_i32_0 = arith.constant 0 : i32
    return %arg0, %c0_i32 : i32, i32
  }
}

</mosaic_0001>

<bundles_post_ra>
// kernel: tpu_custom_call.1
= control target key start
LH: loop header
LB: loop body
LE: loop exit
PB: predicated region body
PF: predicated region fallthrough
CT: control target
= control target key end

     0   :  { %10 = vsyncpa [#allocation4], 0  ;;  %s1407_s0 = inlined_call_operand.hbm [shape: f32[16,32], index: 0, kind: input, shape index: {}]   ;;  %s1408_s1 = inlined_call_operand.vmem [shape: f32[1,32], index: 1, kind: input, shape index: {}]   ;;  %s1409_s2 = inlined_call_operand.vmem [shape: f32[1,32], index: 2, kind: input, shape index: {}]   ;;  %s1410_s3 = inlined_call_operand.hbm [shape: bf16[32,96], index: 3, kind: input, shape index: {}]   ;;  %s1411_s4 = inlined_call_operand.hbm [shape: bf16[32,32], index: 4, kind: input, shape index: {}]   ;;  %s1412_s5 = inlined_call_operand.hbm [shape: f32[16,32], index: 5, kind: output, shape index: {}]  }
   0x1   :  { %12 = vsyncpa [#allocation4 + $0x1], 0 }
   0x2   :  { %13 = vsyncpa [#allocation7], 0 }
   0x3   :  { %14 = vsyncpa [#allocation5], 0 }
   0x4   :  { %16 = vsyncpa [#allocation5 + $0x1], 0  ;;  %s1132_s18 = smov 0   ;;  %s1134_s19 = smov 0  }
   0x5   :  { %s1136_s20 = smov 0   ;;  %s1138_s21 = smov 0  }
   0x6 LB: > { %s1153_s22 = sadd.s32 4294967295, %s1086_s21   ;;  %s757_s23 = sadd.s32 4294967294, %s1086_s21   ;;  %s1086_s21 = sphi %s1138_s21, %s1432_s21   ;;  %s1082_s20 = sphi %s1136_s20, %s1431_s20   ;;  %s1078_s19 = sphi %s1134_s19, %s1430_s19   ;;  %s1074_s18 = sphi %s1132_s18, %s1429_s18  }
   0x7   : > { %p42_p0 = scmp.ne.s32.totalorder %s1078_s19, %s1074_s18  ;;  %p1413_p1 = scmp.eq.s32.totalorder %s1153_s22, 0 }
   0x8   : > { %p156_p3 = scmp.eq.s32.totalorder %s757_s23, 1  ;;  %p758_p5 = scmp.ge.s32.totalorder %s1086_s21, 1 }
   0x9   : > { %p1162_p4 = por %p1413_p1, %p42_p0  ;;  %p163_p7 = scmp.lt.s32.totalorder %s1086_s21, 3 }
   0xa   : > { %p1167_p6 = por %p156_p3, %p42_p0  ;;  %s1088_s27 = smov [#allocation6]  }
   0xb   : > { %s1416_s24 = scalar_select %p1162_p4, 1, 0 }
   0xc   : > { %s1417_s25 = scalar_select %p1167_p6, 1, 0 }
   0xd   : > { %p1172_p8 = pnand %p758_p5, %p163_p7  ;;  %s181_s28 = sshll.u32 %s1088_s27, 4  ;;  %s1176_s28 = int_to_ptr.vmem [resolvable:$true] %s181_s28 }
   0xe   : > { %s1089_s30 = smov [#allocation8]   ;;  %s930_s9 = scalar_lea.hbm %s1410_s3, 256 }
   0xf   : > { %p851_p9 = pneg %p1172_p8  ;;  %s194_s6 = sshll.u32 %s1089_s30, 4  ;;  %s1187_s6 = int_to_ptr.vmem [resolvable:$true] %s194_s6 }
  0x10   : > { %p931_p12 = scmp.ne.s32.totalorder %s1410_s3, %s930_s9  ;;  %p937_p5 = scmp.lt.u32.totalorder %s930_s9, %s1410_s3 }
  0x11   : > { %p1183_p11 = pnand %p851_p9, %p1413_p1 }
  0x13   : > { %p932_p13 = pneg %p1183_p11 }
  0x15   : > { %p933_p0 = pnand %p932_p13, %p931_p12 }
  0x17   : > { %p934_p3 = pneg %p933_p0 }
  0x19   : > { %p939_p7 = pnand %p937_p5, %p934_p3 }
  0x1b   : > { %942 = shalt.err (!%p939_p7)
}
  0x1c   : > { %s943_s14 = scalar_lea.vmem %s1176_s28, 256  ;;  %p951_p2 = scmp.lt.s32.totalorder %s1176_s28, %s1176_s28 }
  0x1d   : > { %p944_p9 = scmp.ne.s32.totalorder %s1176_s28, %s943_s14  ;;  %p952_p12 = scmp.lt.s32.totalorder %s943_s14, %s943_s14 }
  0x1f   : > { %p946_p10 = pnand %p944_p9, %p932_p13  ;;  %p953_p0 = por %p952_p12, %p951_p2 }
  0x21   : > { %p947_p1 = pneg %p946_p10 }
  0x23   : > { %p954_p6 = pnand %p953_p0, %p947_p1 }
  0x25   : > { %957 = shalt.err (!%p954_p6)
}
  0x26   : > { %s1090_s15 = smov 64   ;;  %s1091_s16 = smov 4  }
  0x27   : > { %854 = dma.hbm_to_vmem [thread:$0]  (!%p1183_p11), %s1410_s3, 256, %s1176_s28, [#allocation7], %s1090_s15, %s1090_s15, %s1091_s16  }
  0x28   : > { %s958_s7 = scalar_lea.hbm %s1411_s4, 256 }
  0x29   : > { %p959_p2 = scmp.ne.s32.totalorder %s1411_s4, %s958_s7  ;;  %p965_p10 = scmp.lt.u32.totalorder %s958_s7, %s1411_s4 }
  0x2b   : > { %p961_p1 = pnand %p959_p2, %p932_p13 }
  0x2d   : > { %p962_p6 = pneg %p961_p1 }
  0x2f   : > { %p967_p3 = pnand %p965_p10, %p962_p6 }
  0x31   : > { %970 = shalt.err (!%p967_p3)
}
  0x32   : > { %s971_s28 = scalar_lea.vmem %s1187_s6, 256  ;;  %p979_p12 = scmp.lt.s32.totalorder %s1187_s6, %s1187_s6 }
  0x33   : > { %p972_p5 = scmp.ne.s32.totalorder %s1187_s6, %s971_s28  ;;  %p980_p0 = scmp.lt.s32.totalorder %s971_s28, %s971_s28 }
  0x35   : > { %p974_p7 = pnand %p972_p5, %p932_p13  ;;  %p981_p2 = por %p980_p0, %p979_p12 }
  0x37   : > { %p975_p9 = pneg %p974_p7 }
  0x39   : > { %p982_p1 = pnand %p981_p2, %p975_p9 }
  0x3b   : > { %985 = shalt.err (!%p982_p1)
}
  0x3c   : > { %857 = dma.hbm_to_vmem [thread:$0]  (!%p1183_p11), %s1411_s4, 256, %s1187_s6, [#allocation7], %s1090_s15, %s1090_s15, %s1091_s16  }
  0x3d   : > { %s1242_s14 = sadd.s32 1, %s1086_s21   ;;  %s29_s29 = sadd.s32 1, %s1082_s20 }
  0x3e   : > { %s26_s17 = ssub.s32 %s1086_s21, %s1242_s14  ;;  %p36_p13 = scmp.ne.s32.totalorder %s1082_s20, %s1078_s19 }
  0x3f   : > { %p27_p6 = scmp.eq.s32.totalorder %s26_s17, 0  ;;  %p37_p10 = scmp.eq.s32.totalorder %s1086_s21, 0 }
  0x40   : > { %p1420_p3 = scmp.eq.s32.totalorder %s1153_s22, 1  ;;  %p868_p7 = scmp.lt.s32.totalorder %s1086_s21, 2 }
  0x41   : > { %s1258_s27 = scalar_select %p27_p6, %s1082_s20, %s29_s29  }
  0x42   : > { %p1252_p5 = por %p1420_p3, %p36_p13  ;;  %p38_p9 = por %p37_p10, %p36_p13 }
  0x43   : > { %s208_s30 = sand.u32 1, %s1082_s20   ;;  %s763_s6 = sshll.u32 %s1086_s21, 7 }
  0x44   : > { %s1421_s23 = scalar_select %p1252_p5, 1, 0 }
  0x45   : > { %s762_s7 = sshll.u32 %s208_s30, 3  ;;  %s1265_s8 = scalar_lea.hbm %s1407_s0, %s763_s6 }
  0x46   : > { %s212_s9 = scalar_lea.vmem [#allocation3], %s762_s7  ;;  %p1269_p11 = pnand %p868_p7, %p38_p9 }
  0x47   : > { %s219_s10 = sshll.u32 %s212_s9, 4  ;;  %s209_s28 = scalar_lea.sflag [#allocation4], %s208_s30  ;;  %s1267_s10 = int_to_ptr.vmem [resolvable:$true] %s219_s10 }
  0x48   : > { %s986_s12 = scalar_lea.hbm %s1265_s8, 128  ;;  %p988_p0 = pneg %p1269_p11 }
  0x49   : > { %p987_p12 = scmp.ne.s32.totalorder %s1265_s8, %s986_s12  ;;  %s991_s17 = scalar_lea.hbm %s1407_s0, 256 }
  0x4a   : > { %p992_p13 = scmp.lt.u32.totalorder %s1265_s8, %s1407_s0  ;;  %p993_p6 = scmp.lt.u32.totalorder %s991_s17, %s986_s12 }
  0x4b   : > { %p989_p2 = pnand %p988_p0, %p987_p12  ;;  %p995_p3 = scmp.lt.u32.totalorder %s986_s12, %s1265_s8 }
  0x4c   : > { %p994_p10 = por %p993_p6, %p992_p13 }
  0x4d   : > { %p990_p1 = pneg %p989_p2 }
  0x4e   : > { %p996_p7 = por %p995_p3, %p994_p10 }
  0x50   : > { %p997_p9 = pnand %p996_p7, %p990_p1 }
  0x52   : > { %1000 = shalt.err (!%p997_p9)
}
  0x53   : > { %s1001_s30 = scalar_lea.vmem %s1267_s10, 128  ;;  %s1092_s15 = smov [#allocation3]  }
  0x54   : > { %p1002_p12 = scmp.ne.s32.totalorder %s1267_s10, %s1001_s30  ;;  %s1006_s16 = sshll.u32 %s1092_s15, 4  ;;  %s1007_s16 = int_to_ptr.vmem [resolvable:$false] %s1006_s16 }
  0x55   : > { %s1008_s9 = scalar_lea.vmem %s1007_s16, 256  ;;  %p1009_p4 = scmp.lt.s32.totalorder %s1267_s10, %s1007_s16 }
  0x56   : > { %p1004_p2 = pnand %p1002_p12, %p988_p0  ;;  %p1010_p13 = scmp.lt.s32.totalorder %s1008_s9, %s1001_s30 }
  0x58   : > { %p1005_p5 = pneg %p1004_p2  ;;  %p1011_p6 = por %p1010_p13, %p1009_p4 }
  0x5a   : > { %p1012_p10 = pnand %p1011_p6, %p1005_p5 }
  0x5c   : > { %1015 = shalt.err (!%p1012_p10)
}
  0x5d   : > { %861 = dma.hbm_to_vmem [thread:$0]  (!%p1269_p11), %s1265_s8, 128, %s1267_s10, %s209_s28  }
  0x5e   : > { %228 = sbr.rel (%p1172_p8) target bundleno = 1859 (0x743), region = 40  ;;  %s1301_s12 = sand.u32 (!%p1172_p8), 1, %s1078_s19  }
  0x5f   : > { %s765_s13 = sshll.u32 (!%p1172_p8), %s1301_s12, 3  ;;  %s231_s29 = scalar_lea.sflag (!%p1172_p8), [#allocation4], %s1301_s12 }
  0x60   : > { %s234_s17 = scalar_lea.vmem (!%p1172_p8), [#allocation3], %s765_s13  ;;  %p1423_p4 = scmp.ne.s32.totalorder (!%p1172_p8), %s1416_s24, 0 }
  0x65   : > { %1061 = dma.done.wait (%p1423_p4), %s231_s29, 128  }
  0x66   : > { %1063 = vsyncadd (%p1423_p4), %s231_s29, 4294967168  ;;  %p1424_p5 = scmp.eq.s32.totalorder %s1153_s22, 0 }
  0x68   : > { %1065 = dma.done.wait (%p1424_p5), [#allocation7], 512   ;;  %p1425_p8 = pmov %p1424_p5 }
  0x69   : > { %vm271_vm0 = vcmask 261120   ;;  %v270_v0 = vld [vmem:[%s234_s17] sm:$0xff]  ;;  %v916_v7 = vld [vmem:[#allocation6] sm:$0xff]   ;;  %v1093_v8 = vmov 0.0   ;;  %vm1094_vm1 = vmmov 0   ;;  %v917_v9 = vld [vmem:[#allocation6 + $0x8] sm:$0xff]  }
  0x6a   : > { %1067 = vsyncadd (%p1425_p8), [#allocation7], 4294966784  ;;  %v272_v1 = vsel %vm271_vm0, %v270_v0, 0.0  ;;  %799 = vmatprep.subr.bf16.mxu0 %v1093_v8  ;;  %803 = vmatprep.mubr.msk.bf16.mxu0 %vm1094_vm1, %v1093_v8  ;;  %v769_v14 = vld [vmem:[%s1408_s1] ss:$0 sm:$0xff]  ;;  %s1095_s11 = smov 112  }
  0x6b   : > { %273 = vadd.xlane.f32.xlu0 %v272_v1  ;;  %800 = vmatpush3.bf16.msra.mxu0 %v916_v7  ;;  %v770_v16 = vld [vmem:[%s1409_s2] ss:$0 sm:$0xff]  ;;  %s1096_s28 = smov 96   ;;  %s1097_s7 = smov 80   ;;  %vm366_vm2 = vcmask 130048   ;;  %vm413_vm3 = vcmask 64512  }
  0x6c   : > { %807 = vmatprep.subr.bf16.mxu1 %v1093_v8  ;;  %801 = vmatprep.subr.bf16.mxu0 %v1093_v8  ;;  %s1098_s6 = smov 48   ;;  %s1099_s30 = smov 64   ;;  %vm431_vm4 = vcmask 1043456   ;;  %v918_v62 = vld [vmem:[#allocation8] sm:$0xff]   ;;  %v919_v63 = vld [vmem:[#allocation8 + $0x8] sm:$0xff]   ;;  %vm590_vm5 = vcmask 261248  }
  0x6d   : > { %809 = vmatprep.mubr.msk.bf16.mxu1 %vm1094_vm1, %v1093_v8  ;;  %s1100_s15 = smov 16   ;;  %s782_s16 = sshll.u32 %s1153_s22, 7 }
  0x6e   : > { %s268_s9 = scalar_lea.vmem [#allocation9], %s765_s13  ;;  %s1362_s26 = scalar_lea.hbm %s1412_s5, %s782_s16 }
  0x6f   : > { %802 = vmatpush3.bf16.msra.mxu0 %v917_v9  ;;  %s668_s29 = sshll.u32 %s268_s9, 4  ;;  %s655_s8 = scalar_lea.sflag [#allocation5], %s1301_s12  ;;  %s1364_s29 = int_to_ptr.vmem [resolvable:$true] %s668_s29 }
  0x70   : > { %813 = vmatprep.subr.bf16.mxu0 %v1093_v8  ;;  %s1016_s22 = scalar_lea.vmem %s1364_s29, 128  ;;  %p1426_p0 = scmp.ne.s32.totalorder %s1421_s23, 0 }
  0x71   : > { %p1017_p11 = scmp.ne.s32.totalorder %s1364_s29, %s1016_s22  ;;  %s1101_s13 = smov [#allocation9]  }
  0x72   : > { %s1020_s10 = sshll.u32 %s1101_s13, 4  ;;  %s1021_s10 = int_to_ptr.vmem [resolvable:$false] %s1020_s10 }
  0x73   : > { %p1018_p1 = pnand %p1017_p11, %p1426_p0  ;;  %p1023_p7 = scmp.lt.s32.totalorder %s1364_s29, %s1021_s10 }
  0x75   : > { %p1019_p3 = pneg %p1018_p1 }
  0xf8   : > { %v274_v2 = vpop.xlane.xlu0 %273 }
  0xf9   : > { %v276_v3 = vmul.f32 0.03125, %v274_v2 }
  0xfb   : > { %v277_v4 = vsub.f32 %v270_v0, %v276_v3 }
  0xfd   : > { %v278_v5 = vmul.f32 %v277_v4, %v277_v4 }
  0xff   : > { %v279_v6 = vsel %vm271_vm0, %v278_v5, 0.0 }
 0x100   : > { %280 = vadd.xlane.f32.xlu0 %v279_v6 }
 0x18d   : > { %v281_v10 = vpop.xlane.xlu0 %280 }
 0x18e   : > { %v282_v11 = vmul.f32 0.03125, %v281_v10 }
 0x190   : > { %v283_v12 = vadd.f32 1e-05, %v282_v11 }
 0x192   : > { %920 = vrsqrt.f32 %v283_v12 }
 0x19c   : > { %v921_v13 = vpop.eup %920 }
 0x19d   : > { %v285_v15 = vmul.f32 %v921_v13, %v277_v4 }
 0x19f   : > { %v293_v17 = vmul.f32 %v769_v14, %v285_v15 }
 0x1a1   : > { %v301_v18 = vadd.f32 %v770_v16, %v293_v17 }
 0x1a3   : > { %v302_v19 = vpack.c.bf16 %v301_v18, %v301_v18 }
 0x1a5   : > { %804 = vmatmul.mubr.msk.bf16.vlgmr.msra.gmra.mrb[0].mxu0 %vm271_vm0, %v302_v19 }
 0x1a6   : > { %815 = vmatprep.mubr.msk.bf16.mxu0 %vm1094_vm1, %v1093_v8 }
 0x278   : > { %v356_v20 = vpop.f32.mrb[0].mxu0 }
 0x279   : > { %v362_v21 = vpack.c.bf16 %v356_v20, %v356_v20  ;;  %v805_v22 = vpop.f32.mrb[1].mxu0 }
 0x27a   : > { %v359_v23 = vpop.f32.mrb[2].mxu0 }
 0x27b   : > { %476 = vrot.lane.b32.xlu0 %v362_v21, %s1095_s11  ;;  %364 = vrot.lane.b32.xlu1 %v362_v21, %s1096_s28  ;;  %v806_v24 = vpop.f32.mrb[3].mxu0  ;;  %s1022_s11 = scalar_lea.vmem %s1021_s10, 256 }
 0x27c   : > { %p1024_p9 = scmp.lt.s32.totalorder %s1022_s11, %s1016_s22 }
 0x27e   : > { %p1025_p12 = por %p1024_p9, %p1023_p7 }
 0x27f   : > { %478 = vrot.lane.b32.xlu1 %v362_v21, %s1097_s7 }
 0x280   : > { %p1026_p2 = pnand %p1025_p12, %p1019_p3 }
 0x2ed   : > { %v365_v25 = vpop.permute.xlu1 %364  ;;  %v477_v29 = vpop.permute.xlu0 %476 }
 0x2ee   : > { %v371_v26 = vsel %vm366_vm2, %v365_v25, 0 }
 0x2ef   : > { %808 = vmatpush3.bf16.xpose.msra.mxu1 %v371_v26 }
 0x2f0   : > { %819 = vmatprep.subr.bf16.mxu1 %v1093_v8 }
 0x2f1   : > { %v479_v27 = vpop.permute.xlu1 %478 }
 0x2f2   : > { %v484_v28 = vsel %vm366_vm2, %v479_v27, 0 }
 0x2f6   : > { %810 = vmatmul.mubr.msk.bf16.vlgmr.msra.gmra.mrb[0].mxu1 %vm366_vm2, %v362_v21 }
 0x2f7   : > { %820 = vmatpush3.bf16.xpose.msra.mxu1 %v484_v28  ;;  %821 = vmatprep.mubr.msk.bf16.mxu1 %vm1094_vm1, %v1093_v8 }
 0x2f8   : > { %831 = vmatprep.subr.bf16.mxu1 %v1093_v8 }
 0x2fe   : > { %822 = vmatmul.mubr.msk.bf16.vlgmr.msra.gmra.mrb[4].mxu1 %vm366_vm2, %v477_v29 }
 0x2ff   : > { %835 = vmatprep.mubr.msk.bf16.mxu1 %vm1094_vm1, %v1093_v8  ;;  %832 = vmatpush3.bf16.msra.mxu1 %v918_v62 }
 0x300   : > { %833 = vmatprep.subr.bf16.mxu1 %v1093_v8 }
 0x303   : > { %834 = vmatpush3.bf16.msra.mxu1 %v919_v63 }
 0x3c9   : > { %v407_v30 = vpop.f32.mrb[0].mxu1 }
 0x3ca   : > { %v811_v31 = vpop.f32.mrb[1].mxu1  ;;  %v414_v32 = vsel %vm413_vm3, %v407_v30, -inf }
 0x3cb   : > { %415 = vmax.xlane.f32.xlu1 %v414_v32  ;;  %v410_v33 = vpop.f32.mrb[2].mxu1 }
 0x3cc   : > { %v812_v34 = vpop.f32.mrb[3].mxu1 }
 0x3d1   : > { %v520_v35 = vpop.f32.mrb[4].mxu1 }
 0x3d2   : > { %v823_v36 = vpop.f32.mrb[5].mxu1  ;;  %v526_v37 = vsel %vm413_vm3, %v520_v35, -inf }
 0x3d3   : > { %527 = vmax.xlane.f32.xlu0 %v526_v37  ;;  %v523_v38 = vpop.f32.mrb[6].mxu1 }
 0x3d4   : > { %v824_v39 = vpop.f32.mrb[7].mxu1 }
 0x3e9   : > { %538 = vrot.lane.b32.xlu0 %v362_v21, %s1098_s6 }
 0x458   : > { %v416_v40 = vpop.xlane.xlu1 %415 }
 0x459   : > { %v417_v41 = vsub.f32 %v407_v30, %v416_v40 }
 0x45b   : > { %v418_v42 = vmul.f32 1.442695, %v417_v41 }
 0x45d   : > { %922 = vpow2.f32 %v418_v42 }
 0x460   : > { %v528_v43 = vpop.xlane.xlu0 %527 }
 0x461   : > { %v529_v44 = vsub.f32 %v520_v35, %v528_v43 }
 0x463   : > { %v530_v45 = vmul.f32 1.442695, %v529_v44 }
 0x464   : > { %v539_v56 = vpop.permute.xlu0 %538 }
 0x465   : > { %924 = vpow2.f32 %v530_v45  ;;  %v544_v58 = vsel %vm431_vm4, %v539_v56, 0 }
 0x467   : > { %v923_v46 = vpop.eup %922 }
 0x468   : > { %v420_v47 = vsel %vm413_vm3, %v923_v46, 0.0 }
 0x469   : > { %421 = vadd.xlane.f32.xlu1 %v420_v47 }
 0x46f   : > { %v925_v48 = vpop.eup %924 }
 0x470   : > { %v532_v49 = vsel %vm413_vm3, %v925_v48, 0.0 }
 0x471   : > { %533 = vadd.xlane.f32.xlu1 %v532_v49 }
 0x482   : > { %426 = vrot.lane.b32.xlu1 %v362_v21, %s1099_s30 }
 0x4f6   : > { %v422_v50 = vpop.xlane.xlu1 %421 }
 0x4f7   : > { %926 = vrcp.f32 %v422_v50 }
 0x4fe   : > { %v534_v51 = vpop.xlane.xlu1 %533 }
 0x4ff   : > { %928 = vrcp.f32 %v534_v51 }
 0x501   : > { %v927_v52 = vpop.eup %926 }
 0x502   : > { %v424_v53 = vmul.f32 %v927_v52, %v923_v46  ;;  %v427_v54 = vpop.permute.xlu1 %426 }
 0x503   : > { %v433_v55 = vsel %vm431_vm4, %v427_v54, 0 }
 0x504   : > { %814 = vmatpush3.bf16.msra.mxu0 %v433_v55  ;;  %v425_v57 = vpack.c.bf16 %v424_v53, %v424_v53 }
 0x505   : > { %825 = vmatprep.subr.bf16.mxu0 %v1093_v8 }
 0x507   : > { %816 = vmatmul.mubr.msk.bf16.vlgmr.msra.gmra.mrb[4].mxu0 %vm413_vm3, %v425_v57 }
 0x508   : > { %826 = vmatpush3.bf16.msra.mxu0 %v544_v58  ;;  %827 = vmatprep.mubr.msk.bf16.mxu0 %vm1094_vm1, %v1093_v8 }
 0x509   : > { %v929_v59 = vpop.eup %928 }
 0x50a   : > { %v536_v60 = vmul.f32 %v929_v59, %v925_v48 }
 0x50c   : > { %v537_v61 = vpack.c.bf16 %v536_v60, %v536_v60 }
 0x50f   : > { %828 = vmatmul.mubr.msk.bf16.vlgmr.msra.gmra.mrb[8].mxu0 %vm413_vm3, %v537_v61 }
 0x5da   : > { %v469_v0 = vpop.f32.mrb[4].mxu0 }
 0x5db   : > { %475 = vst.msk [vmem:[#allocation2] sm:$0xff] %vm366_vm2, %v469_v0  ;;  %v817_v1 = vpop.f32.mrb[5].mxu0 }
 0x5dc   : > { %v472_v2 = vpop.f32.mrb[6].mxu0 }
 0x5dd   : > { %v818_v3 = vpop.f32.mrb[7].mxu0 }
 0x5e2   : > { %v580_v4 = vpop.f32.mrb[8].mxu0 }
 0x5e3   : > { %587 = vrot.lane.b32.xlu1 %v580_v4, %s1100_s15  ;;  %v829_v5 = vpop.f32.mrb[9].mxu0 }
 0x5e4   : > { %v583_v6 = vpop.f32.mrb[10].mxu0 }
 0x5e5   : > { %v830_v7 = vpop.f32.mrb[11].mxu0 }
 0x655   : > { %v588_v9 = vpop.permute.xlu1 %587 }
 0x656   : > { %591 = vst.msk [vmem:[#allocation2] sm:$0xff] %vm590_vm5, %v588_v9 }
 0x65d   : > { %v592_v8 = vld [vmem:[#allocation2] sm:$0xff] }
 0x65e   : > { %v593_v10 = vpack.c.bf16 %v592_v8, %v592_v8 }
 0x660   : > { %836 = vmatmul.mubr.msk.bf16.vlgmr.msra.gmra.mrb[8].mxu1 %vm271_vm0, %v593_v10 }
 0x733   : > { %v647_v11 = vpop.f32.mrb[8].mxu1 }
 0x734   : > { %653 = vst.msk [vmem:[%s268_s9] sm:$0xff] %vm271_vm0, %v647_v11  ;;  %v837_v12 = vpop.f32.mrb[9].mxu1 }
 0x735   : > { %v650_v13 = vpop.f32.mrb[10].mxu1 }
 0x736   : > { %1029 = shalt.err (!%p1026_p2)
}
 0x737   : > { %s1030_s12 = scalar_lea.hbm %s1362_s26, 128  ;;  %s1034_s6 = scalar_lea.hbm %s1412_s5, 256 }
 0x738   : > { %p1031_p13 = scmp.ne.s32.totalorder %s1362_s26, %s1030_s12  ;;  %p1035_p4 = scmp.lt.u32.totalorder %s1362_s26, %s1412_s5 }
 0x739   : > { %p1036_p5 = scmp.lt.u32.totalorder %s1034_s6, %s1030_s12  ;;  %p1038_p11 = scmp.lt.u32.totalorder %s1030_s12, %s1362_s26 }
 0x73a   : > { %p1032_p6 = pnand %p1031_p13, %p1426_p0 }
 0x73b   : > { %p1037_p8 = por %p1036_p5, %p1035_p4 }
 0x73c   : > { %p1033_p10 = pneg %p1032_p6 }
 0x73d   : > { %p1039_p1 = por %p1038_p11, %p1037_p8 }
 0x73f   : > { %p1040_p3 = pnand %p1039_p1, %p1033_p10 }
 0x741   : > { %1043 = shalt.err (!%p1040_p3)
}
 0x742   : > { %849 = dma.vmem_to_hbm [thread:$0]  (%p1426_p0), %s1364_s29, 128, %s1362_s26, %s655_s8   ;;  %v838_v14 = vpop.f32.mrb[11].mxu1 }
 0x743 PF: > { %s680_s16 = sand.u32 1, %s1074_s18   ;;  %p1427_p7 = scmp.ne.s32.totalorder %s1417_s25, 0 }
 0x744   : > { %p1428_p9 = scmp.ge.s32.totalorder %s1086_s21, 2  ;;  %s681_s9 = scalar_lea.sflag [#allocation5], %s680_s16 }
 0x746   : > { %p863_p12 = pnand %p1428_p9, %p1427_p7 }
 0x748   : > { %1069 = dma.done.wait (!%p863_p12), %s681_s9, 128  }
 0x749   : > { %1071 = vsyncadd (!%p863_p12), %s681_s9, 4294967168  ;;  %p19_p2 = scmp.ge.s32.totalorder %s1242_s14, 4   ;;  %s1429_s18 = smov %s1078_s19 }
 0x74a   : > { %s1430_s19 = smov %s1082_s20  ;;  %s1431_s20 = smov %s1258_s27 }
 0x74b   : > { %s1432_s21 = smov %s1242_s14  ;;  %21 = sbr.rel (!%p19_p2) target bundleno = 6 (0x6), region = 93 }
 0x752   :  { %686 = vsyncpa [#allocation4], 1 }
 0x753   :  { %688 = vsyncpa [#allocation4 + $0x1], 1 }
 0x754   :  { %689 = vsyncpa [#allocation7], 1 }
 0x755   :  { %690 = vsyncpa [#allocation5], 1 }
 0x756   :  { %692 = vsyncpa [#allocation5 + $0x1], 1 }

</bundles_post_ra>
